<compile_context>
chip_gen: v5e
topology: v5e:2x2
jax: 0.10.0
libtpu: 0.0.40
codegen_flags: <defaults>
</compile_context>

<pallas_src>
import math
import jax
import jax.numpy as jnp
from jax.experimental import pallas as pl
from jax.experimental.pallas import tpu as pltpu


def _round_up(x, m):
    return ((x + m - 1) // m) * m


def make_mlp_kernel(n_linear, use_bf16_matmul=False):
    """Pallas kernel for an MLP with `n_linear` Linear layers, Tanh after every layer
    except the last (matches Base_net.forward). Feature-major layout: activations are
    (features, tile_n), batch on the 128-lane axis."""

    def kernel(*refs):
        x_ref, y_ref = refs[0], refs[1]          # (1, tile_n) each
        out_ref = refs[-1]                       # (d_out, tile_n)
        p = refs[2:-1]                           # alternating W (out, in), b (out, 1)

        x = x_ref[...]                           # (1, tile_n)
        y = y_ref[...]                           # (1, tile_n)

        # Layer 0: W0 is (h1, 2); expanded as two rank-1 VPU updates (also fuses the
        # torch.cat((x, y), 1)).  Per review: keep as-is — the MXU is the binding
        # unit for the remaining layers and VPU/EUP slots are free filler here.
        w0 = p[0][...]                           # (h1, 2)
        b0 = p[1][...]                           # (h1, 1)
        z = w0[:, 0:1] * x + w0[:, 1:2] * y + b0  # (h1, tile_n)
        a = jnp.tanh(z) if n_linear > 1 else z

        # Remaining layers: lane-dense (d_out, tile_n) matmuls on the MXU.
        for li in range(1, n_linear):
            w = p[2 * li][...]                   # (d_out, d_in)
            b = p[2 * li + 1][...]               # (d_out, 1)
            if use_bf16_matmul:
                # v6e/v7x fast path: bf16 MXU inputs, f32 accumulate (looser accuracy
                # than the f32 reference; gate behind the flag).
                z = jnp.dot(w.astype(jnp.bfloat16), a.astype(jnp.bfloat16),
                            preferred_element_type=jnp.float32) + b
            else:
                z = jnp.dot(w, a, preferred_element_type=jnp.float32) + b
            a = jnp.tanh(z) if li < n_linear - 1 else z

        out_ref[...] = a                          # f32 output (lane-dense store)

    return kernel


def init_params(key, layers):
    """Xavier-uniform weights, zero biases (as in Base_net.__init__).
    Weights stored PyTorch-style (out_features, in_features); bias (out, 1)."""
    params = []
    for i in range(len(layers) - 1):
        fan_in, fan_out = layers[i], layers[i + 1]
        key, sub = jax.random.split(key)
        bound = math.sqrt(6.0 / (fan_in + fan_out))
        w = jax.random.uniform(sub, (fan_out, fan_in), jnp.float32, -bound, bound)
        b = jnp.zeros((fan_out, 1), jnp.float32)
        params.append((w, b))
    return params


def base_net_forward(x, y, params, layers, tile_n=8192, use_bf16_matmul=False):
    """Pallas implementation of Base_net.forward(x, y).

    x, y: (N, 1) float32. Returns (N, layers[-1]) float32.
    tile_n: batch tile on the lane axis (multiple of 128). Default 8192; sweep
    8192-16384 for large N (per-step live VMEM at these feature widths is only a
    few MiB, so the tile is overhead-limited, not VMEM-limited)."""
    N = x.shape[0]
    assert x.shape == (N, 1) and y.shape == (N, 1)
    assert layers[0] == 2, "Base_net concatenates exactly (x, y) -> 2 input features"
    d_out = layers[-1]
    n_linear = len(layers) - 1
    assert len(params) == n_linear

    # (N, 1) -> (1, N): contiguous, metadata-only reshape (no HBM pass).
    x_t = x.reshape(1, N)
    y_t = y.reshape(1, N)

    # Batch tile on the lane axis.  No host-side padding: grid = cdiv(N, tile) and
    # Pallas masks the ragged last block (padded-lane garbage is per-lane confined
    # and its output lanes are dropped on store).
    tile = min(tile_n, _round_up(N, 128))
    tile = _round_up(tile, 128)
    # v7x has 2 TensorCores sharing the "parallel" grid axis: guarantee >= 2 steps
    # whenever N allows it so both cores get work (no effect on v5e/v6e's single TC).
    if N > 128 and pl.cdiv(N, tile) < 2:
        tile = _round_up(pl.cdiv(N, 2), 128)
    n_steps = pl.cdiv(N, tile)

    kernel = make_mlp_kernel(n_linear, use_bf16_matmul)

    # Activations: tiled over the batch (lane) axis.
    in_specs = [
        pl.BlockSpec((1, tile), lambda i: (0, i)),
        pl.BlockSpec((1, tile), lambda i: (0, i)),
    ]
    flat_params = []
    for (w, b) in params:
        # Whole weight / bias resident across the grid (constant index_map => fetched
        # once).  pl.Buffered(1) would drop their duplicate double-buffer copy, but at
        # <20 KB total it is noise at these widths; revisit if hidden sizes grow.
        in_specs.append(pl.BlockSpec(w.shape, lambda i: (0, 0)))
        in_specs.append(pl.BlockSpec(b.shape, lambda i: (0, 0)))
        flat_params.extend([w, b])

    out_spec = pl.BlockSpec((d_out, tile), lambda i: (0, i))

    # VMEM budget: double-buffered (1, tile) I/O + a handful of (max_width, tile) f32
    # kernel temporaries + resident params; clamp to <= 48 MiB so the same tile stays
    # safe on v7x's 64 MiB/TC VMEM as well as v5e/v6e's 128 MiB.
    param_bytes = 4 * sum(int(w.size) + int(b.size) for (w, b) in params)
    max_w = max(layers)
    vmem_need = 4 * tile * (2 * 2 * (2 + d_out) + 4 * max_w) + 2 * param_bytes
    vmem_limit = int(min(max(2 * vmem_need, 32 * 1024 * 1024), 48 * 1024 * 1024))

    # Scheduler hint for XLA (cheap, helps overlap with surrounding ops).
    flops = 2 * N * sum(layers[i] * layers[i + 1] for i in range(n_linear))
    transcendentals = N * sum(layers[1:-1])
    bytes_accessed = 4 * N * (layers[0] + d_out) + param_bytes
    cost = pl.CostEstimate(
        flops=int(flops),
        transcendentals=int(transcendentals),
        bytes_accessed=int(bytes_accessed),
    )

    out_t = pl.pallas_call(
        kernel,
        out_shape=jax.ShapeDtypeStruct((d_out, N), jnp.float32),
        grid_spec=pltpu.PrefetchScalarGridSpec(
            num_scalar_prefetch=0,
            grid=(n_steps,),
            in_specs=in_specs,
            out_specs=out_spec,
        ),
        compiler_params=pltpu.CompilerParams(
            dimension_semantics=("parallel",),
            vmem_limit_bytes=vmem_limit,
        ),
        cost_estimate=cost,
    )(x_t, y_t, *flat_params)

    # Back to batch-major (N, d_out); for d_out == 1 this transpose is layout-only.
    return out_t.T


def base_net_forward_ref(x, y, params):
    """Plain-JAX reference (batch-major, like the PyTorch module)."""
    a = jnp.concatenate([x, y], axis=1)
    n_linear = len(params)
    for li, (w, b) in enumerate(params):
        z = a @ w.T + b.T
        a = jnp.tanh(z) if li < n_linear - 1 else z
    return a


# TODO(synk): Base_net's loss_* / compute_gradient_norm helpers need autograd
# (gradients of u w.r.t. inputs / parameters); only the forward pass is a Pallas
# kernel here -- those would be built with jax.grad around this forward.

if __name__ == "__main__":
    # config.model.layers analogue: 2 inputs (x, y) -> 32 -> 32 -> 1 output
    layers = [2, 32, 32, 1]

    key = jax.random.PRNGKey(0)
    kx, ky, kp = jax.random.split(key, 3)
    params = init_params(kp, layers)

    # Two small cases: ragged N (exercises the masked partial last block + 2-step
    # grid) and a tile-divisible N (exercises the even-split / exact-fit path).
    for N in (300, 1024):
        kx, sx = jax.random.split(kx)
        ky, sy = jax.random.split(ky)
        x = jax.random.normal(sx, (N, 1), jnp.float32)
        y = jax.random.normal(sy, (N, 1), jnp.float32)

        out = base_net_forward(x, y, params, layers)
        out = jax.block_until_ready(out)

        ref = base_net_forward_ref(x, y, params)
        assert out.shape == (N, layers[-1])
        assert jnp.allclose(out, ref, atol=2e-5, rtol=2e-5), f"mismatch vs reference (N={N})"

    print("KERNEL_OK")
</pallas_src>

<mosaic_0001>
module attributes {stable_mosaic.version = 11 : i64} {
  func.func @kernel(%arg0: i32, %arg1: memref<1x256xf32, #tpu.memory_space<vmem>>, %arg2: memref<1x256xf32, #tpu.memory_space<vmem>>, %arg3: memref<32x2xf32, #tpu.memory_space<vmem>>, %arg4: memref<32x1xf32, #tpu.memory_space<vmem>>, %arg5: memref<32x32xf32, #tpu.memory_space<vmem>>, %arg6: memref<32x1xf32, #tpu.memory_space<vmem>>, %arg7: memref<1x32xf32, #tpu.memory_space<vmem>>, %arg8: memref<1x1xf32, #tpu.memory_space<vmem>>, %arg9: memref<1x256xf32, #tpu.memory_space<vmem>>) attributes {dimension_semantics = [#tpu.dimension_semantics<parallel>], iteration_bounds = array<i64: 2>, scalar_prefetch = 0 : i64, scratch_operands = 0 : i64, tpu.core_type = #tpu.core_type<tc>, window_params = [{transform_indices = @transform_0, window_bounds = array<i64: 1, 256>}, {transform_indices = @transform_1, window_bounds = array<i64: 1, 256>}, {pipeline_mode = #tpu.pipeline_mode<synchronous>, transform_indices = @transform_2, window_bounds = array<i64: 32, 2>}, {pipeline_mode = #tpu.pipeline_mode<synchronous>, transform_indices = @transform_3, window_bounds = array<i64: 32, 1>}, {pipeline_mode = #tpu.pipeline_mode<synchronous>, transform_indices = @transform_4, window_bounds = array<i64: 32, 32>}, {pipeline_mode = #tpu.pipeline_mode<synchronous>, transform_indices = @transform_5, window_bounds = array<i64: 32, 1>}, {pipeline_mode = #tpu.pipeline_mode<synchronous>, transform_indices = @transform_6, window_bounds = array<i64: 1, 32>}, {pipeline_mode = #tpu.pipeline_mode<synchronous>, transform_indices = @transform_7, window_bounds = array<i64: 1, 1>}, {transform_indices = @transform_8, window_bounds = array<i64: 1, 256>}]} {
    %c0 = arith.constant 0 : index
    %c0_0 = arith.constant 0 : index
    %0 = vector.load %arg1[%c0, %c0_0] : memref<1x256xf32, #tpu.memory_space<vmem>>, vector<1x256xf32>
    %c0_1 = arith.constant 0 : index
    %c0_2 = arith.constant 0 : index
    %1 = vector.load %arg2[%c0_1, %c0_2] : memref<1x256xf32, #tpu.memory_space<vmem>>, vector<1x256xf32>
    %c0_3 = arith.constant 0 : index
    %c0_4 = arith.constant 0 : index
    %2 = vector.load %arg3[%c0_3, %c0_4] : memref<32x2xf32, #tpu.memory_space<vmem>>, vector<32x2xf32>
    %c0_5 = arith.constant 0 : index
    %c0_6 = arith.constant 0 : index
    %3 = vector.load %arg4[%c0_5, %c0_6] : memref<32x1xf32, #tpu.memory_space<vmem>>, vector<32x1xf32>
    %4 = vector.extract_strided_slice %2 {offsets = [0, 0], sizes = [32, 1], strides = [1, 1]} : vector<32x2xf32> to vector<32x1xf32>
    %5 = vector.broadcast %4 : vector<32x1xf32> to vector<32x256xf32>
    %6 = vector.broadcast %0 : vector<1x256xf32> to vector<32x256xf32>
    %7 = arith.mulf %5, %6 : vector<32x256xf32>
    %8 = vector.extract_strided_slice %2 {offsets = [0, 1], sizes = [32, 1], strides = [1, 1]} : vector<32x2xf32> to vector<32x1xf32>
    %9 = vector.broadcast %8 : vector<32x1xf32> to vector<32x256xf32>
    %10 = vector.broadcast %1 : vector<1x256xf32> to vector<32x256xf32>
    %11 = arith.mulf %9, %10 : vector<32x256xf32>
    %12 = arith.addf %7, %11 : vector<32x256xf32>
    %13 = vector.broadcast %3 : vector<32x1xf32> to vector<32x256xf32>
    %14 = arith.addf %12, %13 : vector<32x256xf32>
    %15 = math.tanh %14 : vector<32x256xf32>
    %c0_7 = arith.constant 0 : index
    %c0_8 = arith.constant 0 : index
    %16 = vector.load %arg5[%c0_7, %c0_8] : memref<32x32xf32, #tpu.memory_space<vmem>>, vector<32x32xf32>
    %c0_9 = arith.constant 0 : index
    %c0_10 = arith.constant 0 : index
    %17 = vector.load %arg6[%c0_9, %c0_10] : memref<32x1xf32, #tpu.memory_space<vmem>>, vector<32x1xf32>
    %cst = arith.constant dense<0.000000e+00> : vector<32x256xf32>
    %18 = tpu.matmul %16, %15, %cst {dimension_numbers = #tpu.dot_dimension_numbers<[1], [0], [0], [1], [0, 0, 1, 1], [], []>} : vector<32x32xf32>, vector<32x256xf32>, vector<32x256xf32> -> vector<32x256xf32>
    %19 = vector.broadcast %17 : vector<32x1xf32> to vector<32x256xf32>
    %20 = arith.addf %18, %19 : vector<32x256xf32>
    %21 = math.tanh %20 : vector<32x256xf32>
    %c0_11 = arith.constant 0 : index
    %c0_12 = arith.constant 0 : index
    %22 = vector.load %arg7[%c0_11, %c0_12] : memref<1x32xf32, #tpu.memory_space<vmem>>, vector<1x32xf32>
    %c0_13 = arith.constant 0 : index
    %c0_14 = arith.constant 0 : index
    %23 = vector.load %arg8[%c0_13, %c0_14] : memref<1x1xf32, #tpu.memory_space<vmem>>, vector<1x1xf32>
    %cst_15 = arith.constant dense<0.000000e+00> : vector<1x256xf32>
    %24 = tpu.matmul %22, %21, %cst_15 {dimension_numbers = #tpu.dot_dimension_numbers<[1], [0], [0], [1], [0, 0, 1, 1], [], []>} : vector<1x32xf32>, vector<32x256xf32>, vector<1x256xf32> -> vector<1x256xf32>
    %25 = vector.broadcast %23 : vector<1x1xf32> to vector<1x256xf32>
    %26 = arith.addf %24, %25 : vector<1x256xf32>
    %c0_16 = arith.constant 0 : index
    %c0_17 = arith.constant 0 : index
    %27 = vector.load %arg9[%c0_16, %c0_17] : memref<1x256xf32, #tpu.memory_space<vmem>>, vector<1x256xf32>
    tpu.vector_store %arg9[%c0_16, %c0_17], %26 {strides = array<i32>} : memref<1x256xf32, #tpu.memory_space<vmem>>, vector<1x256xf32>,
    return
  }
  func.func @transform_0(%arg0: i32) -> (i32, i32) {
    %c0_i32 = arith.constant 0 : i32
    %c0_i32_0 = arith.constant 0 : i32
    return %c0_i32, %arg0 : i32, i32
  }
  func.func @transform_1(%arg0: i32) -> (i32, i32) {
    %c0_i32 = arith.constant 0 : i32
    %c0_i32_0 = arith.constant 0 : i32
    return %c0_i32, %arg0 : i32, i32
  }
  func.func @transform_2(%arg0: i32) -> (i32, i32) {
    %c0_i32 = arith.constant 0 : i32
    %c0_i32_0 = arith.constant 0 : i32
    %c0_i32_1 = arith.constant 0 : i32
    return %c0_i32, %c0_i32_0 : i32, i32
  }
  func.func @transform_3(%arg0: i32) -> (i32, i32) {
    %c0_i32 = arith.constant 0 : i32
    %c0_i32_0 = arith.constant 0 : i32
    %c0_i32_1 = arith.constant 0 : i32
    return %c0_i32, %c0_i32_0 : i32, i32
  }
  func.func @transform_4(%arg0: i32) -> (i32, i32) {
    %c0_i32 = arith.constant 0 : i32
    %c0_i32_0 = arith.constant 0 : i32
    %c0_i32_1 = arith.constant 0 : i32
    return %c0_i32, %c0_i32_0 : i32, i32
  }
  func.func @transform_5(%arg0: i32) -> (i32, i32) {
    %c0_i32 = arith.constant 0 : i32
    %c0_i32_0 = arith.constant 0 : i32
    %c0_i32_1 = arith.constant 0 : i32
    return %c0_i32, %c0_i32_0 : i32, i32
  }
  func.func @transform_6(%arg0: i32) -> (i32, i32) {
    %c0_i32 = arith.constant 0 : i32
    %c0_i32_0 = arith.constant 0 : i32
    %c0_i32_1 = arith.constant 0 : i32
    return %c0_i32, %c0_i32_0 : i32, i32
  }
  func.func @transform_7(%arg0: i32) -> (i32, i32) {
    %c0_i32 = arith.constant 0 : i32
    %c0_i32_0 = arith.constant 0 : i32
    %c0_i32_1 = arith.constant 0 : i32
    return %c0_i32, %c0_i32_0 : i32, i32
  }
  func.func @transform_8(%arg0: i32) -> (i32, i32) {
    %c0_i32 = arith.constant 0 : i32
    %c0_i32_0 = arith.constant 0 : i32
    return %c0_i32, %arg0 : i32, i32
  }
}

</mosaic_0001>

<bundles_post_ra>
// kernel: tpu_custom_call.1
= control target key start
LH: loop header
LB: loop body
LE: loop exit
PB: predicated region body
PF: predicated region fallthrough
CT: control target
= control target key end

     0   :  { %s1146_s0 = inlined_call_operand.vmem [shape: f32[1,300], index: 0, kind: input, shape index: {}]   ;;  %s1147_s1 = inlined_call_operand.vmem [shape: f32[1,300], index: 1, kind: input, shape index: {}]   ;;  %s1148_s2 = inlined_call_operand.vmem [shape: f32[32,2], index: 2, kind: input, shape index: {}]   ;;  %s1149_s3 = inlined_call_operand.vmem [shape: f32[32,1], index: 3, kind: input, shape index: {}]   ;;  %s1150_s4 = inlined_call_operand.vmem [shape: f32[32,32], index: 4, kind: input, shape index: {}]   ;;  %s1151_s5 = inlined_call_operand.vmem [shape: f32[32,1], index: 5, kind: input, shape index: {}]   ;;  %s1152_s6 = inlined_call_operand.vmem [shape: f32[1,32], index: 6, kind: input, shape index: {}]   ;;  %s1153_s7 = inlined_call_operand.<no memory space> [shape: f32[1,1], index: 7, kind: input, shape index: {}]   ;;  %s1154_s8 = inlined_call_operand.hbm [shape: f32[1,300], index: 8, kind: output, shape index: {}]  }
   0x1   :  { %v13_v0 = vstv %s1153_s7 }
   0x2   :  { %14 = vst [vmem:[#allocation2] sm:$0x1] %v13_v0 }
   0x3   :  { %15 = vsyncpa [#allocation4], 0 }
   0x4   :  { %17 = vsyncpa [#allocation4 + $0x1], 0  ;;  %s966_s29 = smov 0   ;;  %s968_s30 = smov 0  }
   0x5   :  { %s970_s9 = smov 0   ;;  %s972_s10 = smov 0  }
   0x6 LB: > { %s728_s7 = sadd.s32 4294967295, %s913_s10   ;;  %s729_s11 = sadd.s32 4294967294, %s913_s10   ;;  %s913_s10 = sphi %s972_s10, %s1160_s10   ;;  %s909_s9 = sphi %s970_s9, %s1159_s9   ;;  %s905_s30 = sphi %s968_s30, %s1158_s30   ;;  %s901_s29 = sphi %s966_s29, %s1157_s29  }
   0x7   : > { %s989_s12 = sadd.s32 1, %s913_s10   ;;  %s208_s13 = sadd.s32 1, %s909_s9 }
   0x8   : > { %s205_s14 = ssub.s32 %s913_s10, %s989_s12  ;;  %p218_p0 = scmp.ne.s32.totalorder %s909_s9, %s905_s30 }
   0x9   : > { %p206_p1 = scmp.eq.s32.totalorder %s205_s14, 0  ;;  %p219_p2 = scmp.eq.s32.totalorder %s728_s7, 1 }
   0xa   : > { %p224_p3 = scmp.ne.s32.totalorder %s905_s30, %s901_s29  ;;  %p225_p4 = scmp.eq.s32.totalorder %s729_s11, 1 }
   0xb   : > { %s1001_s15 = scalar_select %p206_p1, %s909_s9, %s208_s13  }
   0xc   : > { %p1003_p5 = por %p219_p2, %p218_p0  ;;  %p1007_p6 = por %p225_p4, %p224_p3 }
   0xd   : > { %p732_p7 = scmp.ge.s32.totalorder %s913_s10, 1  ;;  %p289_p8 = scmp.lt.s32.totalorder %s913_s10, 3 }
   0xf   : > { %p290_p9 = pnand %p732_p7, %p289_p8 }
  0x10   : > { %s1051_s28 = sshll.u32 (!%p290_p9), %s728_s7, 1 }
  0x11   : > { %293 = sbr.rel (%p290_p9) target bundleno = 504 (0x1f8), region = 52  ;;  %p336_p10 = scmp.lt.s32.totalorder (!%p290_p9), %s1051_s28, 2 }
  0x16   : > { %v363_v1 = vld [vmem:[%s1148_s2 + $0x18] sm:$0xff]  ;;  %v362_v2 = vld [vmem:[%s1148_s2 + $0x10] sm:$0xff]  ;;  %v915_v3 = vmov 0   ;;  %v361_v4 = vld [vmem:[%s1148_s2 + $0x8] sm:$0xff]  ;;  %v916_v5 = vmov 1   ;;  %s337_s11 = scalar_select %p336_p10, %s1051_s28, 2 }
  0x17   : > { %801 = vset.pattern.permute.xlu1 %v915_v3  ;;  %799 = vset.pattern.permute.xlu0 %v915_v3  ;;  %v360_v6 = vld [vmem:[%s1148_s2] sm:$0xff]  ;;  %v367_v7 = vld [vmem:[%s1149_s3 + $0x18] sm:$0xff]  ;;  %v366_v8 = vld [vmem:[%s1149_s3 + $0x10] sm:$0xff]  ;;  %vm502_vm0 = vcmask 261120   ;;  %vm635_vm1 = vcmask 1040384   ;;  %s652_s7 = ssub.s32 (%p1003_p5), 3, %s1051_s28 }
  0x18   : > { %385 = vperm.xlu0 %799, %v363_v1   ;;  %380 = vperm.xlu1 %801, %v362_v2   ;;  %v364_v9 = vld [vmem:[%s1149_s3] sm:$0xff]  ;;  %v365_v10 = vld [vmem:[%s1149_s3 + $0x8] sm:$0xff]  ;;  %v481_v11 = vld [vmem:[%s1151_s5 + $0x18] sm:$0xff]  ;;  %s349_s18 = scalar_lea.vmem %s1147_s1, %s337_s11  ;;  %s338_s21 = scalar_lea.vmem %s1146_s0, %s337_s11 }
  0x19   : > { %803 = vset.pattern.permute.xlu2 %v915_v3  ;;  %v582_v12 = vld [vmem:[#allocation2] sm:$0x1]  ;;  %v480_v13 = vld [vmem:[%s1151_s5 + $0x10] sm:$0xff]  ;;  %v479_v14 = vld [vmem:[%s1151_s5 + $0x8] sm:$0xff]  ;;  %p653_p11 = scmp.lt.s32.totalorder (%p1003_p5), %s652_s7, 2 }
  0x1a   : > { %375 = vperm.xlu2 %803, %v361_v4   ;;  %v478_v15 = vld [vmem:[%s1151_s5] sm:$0xff] }
  0x1b   : > { %v359_v20 = vld [vmem:[%s349_s18] sm:$0x3]  ;;  %s329_s18 = sand.u32 1, %s905_s30  }
  0x1c   : > { %v358_v23 = vld [vmem:[%s338_s21] sm:$0x3]  ;;  %v418_v24 = vperm.slane %v359_v20, 0  ;;  %v419_v25 = vperm.slane %v359_v20, 1  ;;  %s733_s19 = sshll.u32 %s329_s18, 1  ;;  %s1087_s21 = scalar_lea.sflag [#allocation4], %s329_s18 }
  0x1d   : > { %v389_v26 = vperm.slane %v358_v23, 0  ;;  %v390_v27 = vperm.slane %v358_v23, 1  ;;  %s331_s20 = scalar_lea.vmem [#allocation3], %s733_s19 }
  0x20   : > { %800 = vset.pattern.permute.xlu0 %v916_v5  ;;  %802 = vset.pattern.permute.xlu1 %v916_v5 }
  0x21   : > { %414 = vperm.xlu0 %800, %v363_v1   ;;  %410 = vperm.xlu1 %802, %v362_v2  }
  0x22   : > { %804 = vset.pattern.permute.xlu2 %v916_v5 }
  0x23   : > { %406 = vperm.xlu2 %804, %v361_v4  }
  0x29   : > { %805 = vset.pattern.permute.xlu1 %v915_v3  ;;  %402 = vperm.xlu0 %800, %v360_v6  }
  0x2a   : > { %455 = vperm.xlu1 %805, %v367_v7  }
  0x2b   : > { %806 = vset.pattern.permute.xlu2 %v915_v3 }
  0x2c   : > { %370 = vperm.xlu2 %806, %v360_v6  }
  0x31   : > { %807 = vset.pattern.permute.xlu0 %v915_v3 }
  0x32   : > { %450 = vperm.xlu1 %805, %v366_v8   ;;  %440 = vperm.xlu0 %807, %v364_v9   ;;  %v474_v9 = vld [vmem:[%s1150_s4] sm:$0xff] }
  0x34   : > { %445 = vperm.xlu2 %806, %v365_v10   ;;  %v477_v10 = vld [vmem:[%s1150_s4 + $0x18] sm:$0xff] }
  0x3a   : > { %499 = vperm.xlu1 %805, %v481_v11   ;;  %585 = vperm.xlu0 %807, %v582_v12   ;;  %v475_v12 = vld [vmem:[%s1150_s4 + $0x8] sm:$0xff] }
  0x3c   : > { %494 = vperm.xlu2 %806, %v480_v13   ;;  %v476_v13 = vld [vmem:[%s1150_s4 + $0x10] sm:$0xff] }
  0x42   : > { %489 = vperm.xlu1 %805, %v479_v14  }
  0x44   : > { %484 = vperm.xlu2 %806, %v478_v15  }
  0x74   : > { %v376_v16 = vpop.permute.xlu2 %375 }
  0x75   : > { %v395_v36 = vmul.f32 %v389_v26, %v376_v16  ;;  %v396_v41 = vmul.f32 %v390_v27, %v376_v16 }
  0x7d   : > { %v407_v19 = vpop.permute.xlu2 %406 }
  0x7e   : > { %v424_v37 = vmul.f32 %v418_v24, %v407_v19  ;;  %v425_v42 = vmul.f32 %v419_v25, %v407_v19 }
  0x80   : > { %v432_v45 = vadd.f32 %v424_v37, %v395_v36  ;;  %v433_v51 = vadd.f32 %v425_v42, %v396_v41 }
  0x86   : > { %v371_v30 = vpop.permute.xlu2 %370 }
  0x87   : > { %v393_v46 = vmul.f32 %v389_v26, %v371_v30  ;;  %v394_v50 = vmul.f32 %v390_v27, %v371_v30 }
  0x8a   : > { %v381_v17 = vpop.permute.xlu1 %380  ;;  %v386_v18 = vpop.permute.xlu0 %385 }
  0x8b   : > { %v399_v31 = vmul.f32 %v389_v26, %v386_v18  ;;  %v400_v32 = vmul.f32 %v390_v27, %v386_v18  ;;  %v397_v47 = vmul.f32 %v389_v26, %v381_v17  ;;  %v398_v48 = vmul.f32 %v390_v27, %v381_v17 }
  0x8e   : > { %v446_v53 = vpop.permute.xlu2 %445 }
  0x8f   : > { %v460_v59 = vadd.f32 %v446_v53, %v432_v45  ;;  %v461_v0 = vadd.f32 %v446_v53, %v433_v51  ;;  %v638_v45 = vlaneseq }
  0x91   : > { %vm640_vm2 = vcmp.lt.s32.totalorder %v638_v45, 256 }
  0x93   : > { %v415_v21 = vpop.permute.xlu0 %414  ;;  %v411_v22 = vpop.permute.xlu1 %410 }
  0x94   : > { %v428_v28 = vmul.f32 %v418_v24, %v415_v21  ;;  %v429_v29 = vmul.f32 %v419_v25, %v415_v21  ;;  %v426_v43 = vmul.f32 %v418_v24, %v411_v22  ;;  %v427_v44 = vmul.f32 %v419_v25, %v411_v22 }
  0x96   : > { %v436_v34 = vadd.f32 %v428_v28, %v399_v31  ;;  %v437_v35 = vadd.f32 %v429_v29, %v400_v32  ;;  %v434_v54 = vadd.f32 %v426_v43, %v397_v47  ;;  %v435_v55 = vadd.f32 %v427_v44, %v398_v48  ;;  %v495_v20 = vpop.permute.xlu2 %494 }
  0x9b   : > { %v403_v33 = vpop.permute.xlu0 %402 }
  0x9c   : > { %v456_v38 = vpop.permute.xlu1 %455  ;;  %v422_v49 = vmul.f32 %v418_v24, %v403_v33  ;;  %v423_v52 = vmul.f32 %v419_v25, %v403_v33 }
  0x9d   : > { %v464_v39 = vadd.f32 %v456_v38, %v436_v34  ;;  %v465_v40 = vadd.f32 %v456_v38, %v437_v35 }
  0x9e   : > { %v430_v62 = vadd.f32 %v422_v49, %v393_v46  ;;  %v431_v1 = vadd.f32 %v423_v52, %v394_v50  ;;  %v485_v31 = vpop.permute.xlu2 %484 }
  0x9f   : > { %808 = vtanh.f32 %v464_v39 }
  0xa0   : > { %810 = vtanh.f32 %v465_v40  ;;  %v581_v40 = vld [vmem:[%s1152_s6] sm:$0x1] }
  0xa4   : > { %v451_v56 = vpop.permute.xlu1 %450  ;;  %v441_v57 = vpop.permute.xlu0 %440 }
  0xa5   : > { %v809_v58 = vpop.eup %808  ;;  %v462_v60 = vadd.f32 %v451_v56, %v434_v54  ;;  %v463_v61 = vadd.f32 %v451_v56, %v435_v55  ;;  %v458_v2 = vadd.f32 %v441_v57, %v430_v62  ;;  %v459_v3 = vadd.f32 %v441_v57, %v431_v1 }
  0xa6   : > { %v811_v63 = vpop.eup %810  ;;  %527 = vmatpush.msra.mxu0 %v809_v58  ;;  %751 = vmatpush.msra.mxu2 %v809_v58 }
  0xa7   : > { %812 = vtanh.f32 %v462_v60  ;;  %556 = vmatpush.msra.mxu1 %v811_v63  ;;  %755 = vmatpush.msra.mxu3 %v811_v63 }
  0xa8   : > { %814 = vtanh.f32 %v463_v61 }
  0xa9   : > { %816 = vtanh.f32 %v460_v59 }
  0xaa   : > { %818 = vtanh.f32 %v461_v0 }
  0xab   : > { %820 = vtanh.f32 %v458_v2 }
  0xac   : > { %822 = vtanh.f32 %v459_v3  ;;  %v500_v16 = vpop.permute.xlu1 %499  ;;  %v586_v43 = vpop.permute.xlu0 %585 }
  0xad   : > { %v813_v4 = vpop.eup %812  ;;  %v588_v44 = vperm.slane %v586_v43, 0 }
  0xae   : > { %v815_v5 = vpop.eup %814  ;;  %528 = vmatpush.msra.mxu0 %v813_v4  ;;  %752 = vmatpush.msra.mxu2 %v813_v4 }
  0xaf   : > { %v817_v6 = vpop.eup %816  ;;  %557 = vmatpush.msra.mxu1 %v815_v5  ;;  %756 = vmatpush.msra.mxu3 %v815_v5 }
  0xb0   : > { %v819_v7 = vpop.eup %818  ;;  %529 = vmatpush.msra.mxu0 %v817_v6  ;;  %753 = vmatpush.msra.mxu2 %v817_v6 }
  0xb1   : > { %v821_v8 = vpop.eup %820  ;;  %558 = vmatpush.msra.mxu1 %v819_v7  ;;  %757 = vmatpush.msra.mxu3 %v819_v7 }
  0xb2   : > { %v823_v11 = vpop.eup %822  ;;  %530 = vmatpush.msra.mxu0 %v821_v8  ;;  %754 = vmatpush.msra.mxu2 %v821_v8 }
  0xb3   : > { %559 = vmatpush.msra.mxu1 %v823_v11  ;;  %758 = vmatpush.msra.mxu3 %v823_v11 }
  0xb4   : > { %736 = vmatmul.msk.f32.vlgmr.msra.gmra.mxu0 %vm502_vm0, %v474_v9  ;;  %739 = vmatmul.msk.f32.vlgmr.msra.gmra.mxu2 %vm502_vm0, %v477_v10  ;;  %v490_v26 = vpop.permute.xlu1 %489 }
  0xb5   : > { %740 = vmatmul.msk.f32.vlgmr.msra.gmra.mxu1 %vm502_vm0, %v474_v9  ;;  %743 = vmatmul.msk.f32.vlgmr.msra.gmra.mxu3 %vm502_vm0, %v477_v10 }
  0xbc   : > { %737 = vmatmul.msk.f32.gmra.mxu0 %vm502_vm0, %v475_v12 }
  0xbd   : > { %741 = vmatmul.msk.f32.gmra.mxu1 %vm502_vm0, %v475_v12 }
  0xc4   : > { %738 = vmatmul.msk.f32.gmra.mxu0 %vm502_vm0, %v476_v13 }
  0xc5   : > { %742 = vmatmul.msk.f32.gmra.mxu1 %vm502_vm0, %v476_v13 }
 0x131   : > { %v532_v14 = vpop.f32.mrf.mxu0 }
 0x132   : > { %v561_v15 = vpop.f32.mrf.mxu1  ;;  %v533_v34 = vadd.f32 %v532_v14, %v485_v31 }
 0x133   : > { %v562_v35 = vadd.f32 %v561_v15, %v485_v31 }
 0x137   : > { %v541_v17 = vpop.f32.mrf.mxu2 }
 0x138   : > { %v542_v18 = vadd.f32 %v541_v17, %v500_v16  ;;  %v570_v19 = vpop.f32.mrf.mxu3 }
 0x139   : > { %v571_v21 = vadd.f32 %v570_v19, %v500_v16  ;;  %v535_v22 = vpop.f32.mrf.mxu0 }
 0x13a   : > { %824 = vtanh.f32 %v542_v18  ;;  %v564_v23 = vpop.f32.mrf.mxu1  ;;  %v536_v28 = vadd.f32 %v535_v22, %v490_v26 }
 0x13b   : > { %826 = vtanh.f32 %v571_v21  ;;  %v565_v32 = vadd.f32 %v564_v23, %v490_v26 }
 0x140   : > { %v825_v24 = vpop.eup %824 }
 0x141   : > { %v827_v25 = vpop.eup %826  ;;  %v538_v27 = vpop.f32.mrf.mxu0  ;;  %604 = vmatpush.msrb.mxu2 %v825_v24 }
 0x142   : > { %v539_v29 = vadd.f32 %v538_v27, %v495_v20  ;;  %v567_v30 = vpop.f32.mrf.mxu1  ;;  %624 = vmatpush.msrb.mxu3 %v827_v25 }
 0x143   : > { %v568_v33 = vadd.f32 %v567_v30, %v495_v20 }
 0x144   : > { %828 = vtanh.f32 %v539_v29 }
 0x145   : > { %830 = vtanh.f32 %v568_v33 }
 0x146   : > { %832 = vtanh.f32 %v536_v28 }
 0x147   : > { %834 = vtanh.f32 %v565_v32 }
 0x148   : > { %836 = vtanh.f32 %v533_v34 }
 0x149   : > { %838 = vtanh.f32 %v562_v35 }
 0x14a   : > { %v829_v36 = vpop.eup %828 }
 0x14b   : > { %v831_v37 = vpop.eup %830  ;;  %605 = vmatpush.msrb.mxu2 %v829_v36 }
 0x14c   : > { %v833_v38 = vpop.eup %832  ;;  %625 = vmatpush.msrb.mxu3 %v831_v37 }
 0x14d   : > { %v835_v39 = vpop.eup %834  ;;  %606 = vmatpush.msrb.mxu2 %v833_v38 }
 0x14e   : > { %v837_v41 = vpop.eup %836  ;;  %626 = vmatpush.msrb.mxu3 %v835_v39 }
 0x14f   : > { %v839_v42 = vpop.eup %838  ;;  %607 = vmatpush.msrb.mxu2 %v837_v41 }
 0x150   : > { %627 = vmatpush.msrb.mxu3 %v839_v42  ;;  %744 = vmatmul.msk.f32.vlgmr.msrb.gmra.mxu2 %vm502_vm0, %v581_v40 }
 0x151   : > { %745 = vmatmul.msk.f32.vlgmr.msrb.gmra.mxu3 %vm502_vm0, %v581_v40 }
 0x1d3   : > { %v609_v46 = vpop.f32.mrf.mxu2 }
 0x1d4   : > { %v629_v47 = vpop.f32.mrf.mxu3  ;;  %v610_v49 = vadd.f32 %v609_v46, %v588_v44 }
 0x1d5   : > { %v630_v48 = vadd.f32 %v629_v47, %v588_v44 }
 0x1d6   : > { %650 = sbr.rel (!%p1003_p5) target bundleno = 504 (0x1f8), region = 56 }
 0x1d7   : > { %v634_v50 = vrot.slane %v630_v48, 7 }
 0x1d9   : > { %v636_v51 = vsel %vm635_vm1, %v610_v49, %v634_v50 }
 0x1da   : > { %642 = vst.msk [vmem:[%s331_s20] sm:$0x3] %vm640_vm2, %v636_v51 }
 0x1db   : > { %s1162_s7 = smov (!%p653_p11, %s652_s7), 2 }
 0x1dc   : > { %s655_s22 = ssub.s32 2, %s1162_s7 }
 0x1dd   : > { %s656_s23 = sshll.u32 %s655_s22, 4 }
 0x1de   : > { %657 = vsyncadd %s1087_s21, %s656_s23  ;;  %p748_p12 = scmp.ne.s32.totalorder %s1162_s7, 0  ;;  %s659_s16 = scalar_lea.hbm %s1154_s8, %s1051_s28 }
 0x1df   : > { %s660_s26 = sshll.u32 %s1162_s7, 4  ;;  %s1102_s27 = sshll.u32 %s331_s20, 4  ;;  %s662_s27 = int_to_ptr.vmem [resolvable:$true] %s1102_s27 }
 0x1e0   : > { %s1105_s11 = sshll.u32 %s659_s16, 4  ;;  %s840_s13 = sshra.s32 %s662_s27, 4  ;;  %s664_s11 = int_to_ptr.hbm [resolvable:$true] %s1105_s11  ;;  %s841_s13 = int_to_ptr.vmem [resolvable:$true] %s840_s13 }
 0x1e1   : > { %s842_s14 = sshrl.u32 %s660_s26, 4  ;;  %s917_s28 = smov [#allocation3]  }
 0x1e2   : > { %s847_s18 = scalar_lea.vmem %s841_s13, %s842_s14  ;;  %s851_s19 = scalar_lea.vmem %s917_s28, 4 }
 0x1e3   : > { %p848_p13 = scmp.ne.s32.totalorder %s841_s13, %s847_s18  ;;  %p853_p2 = scmp.lt.s32.totalorder %s851_s19, %s847_s18 }
 0x1e5   : > { %p849_p0 = pnand %p848_p13, %p748_p12 }
 0x1e7   : > { %p850_p1 = pneg %p849_p0 }
 0x1e9   : > { %p855_p3 = pnand %p853_p2, %p850_p1 }
 0x1eb   : > { %858 = shalt.err (!%p855_p3)
}
 0x1ec   : > { %s859_s20 = sshra.s32 %s664_s11, 4  ;;  %s870_s25 = scalar_lea.hbm %s1154_s8, 3  ;;  %s860_s20 = int_to_ptr.hbm [resolvable:$true] %s859_s20 }
 0x1ed   : > { %s866_s22 = scalar_lea.hbm %s860_s20, %s842_s14  ;;  %p871_p8 = scmp.lt.s32.totalorder %s860_s20, %s1154_s8 }
 0x1ee   : > { %p867_p4 = scmp.ne.s32.totalorder %s860_s20, %s866_s22  ;;  %p872_p9 = scmp.lt.s32.totalorder %s870_s25, %s866_s22 }
 0x1f0   : > { %p868_p5 = pnand %p867_p4, %p748_p12  ;;  %p873_p10 = por %p872_p9, %p871_p8 }
 0x1f2   : > { %p869_p7 = pneg %p868_p5 }
 0x1f4   : > { %p874_p11 = pnand %p873_p10, %p869_p7 }
 0x1f6   : > { %877 = shalt.err (!%p874_p11)
}
 0x1f7   : > { %666 = dma.vmem_to_hbm [thread:$0]  (%p748_p12), %s662_s27, %s660_s26, %s664_s11, %s1087_s21  }
 0x1f8 PF: > { %p764_p13 = scmp.ge.s32.totalorder %s913_s10, 2  ;;  %s675_s14 = sand.u32 1, %s901_s29  }
 0x1f9   : > { %s676_s18 = scalar_lea.sflag [#allocation4], %s675_s14 }
 0x1fa   : > { %p761_p0 = pnand %p764_p13, %p1007_p6 }
 0x1fc   : > { %p762_p1 = pneg %p761_p0 }
 0x1fe   : > { %896 = dma.done.wait (%p762_p1), %s676_s18, 32  }
 0x1ff   : > { %898 = vsyncadd (%p762_p1), %s676_s18, 4294967264  ;;  %p20_p2 = scmp.ge.s32.totalorder %s989_s12, 4   ;;  %s1157_s29 = smov %s905_s30 }
 0x200   : > { %s1158_s30 = smov %s909_s9  ;;  %s1159_s9 = smov %s1001_s15 }
 0x201   : > { %s1160_s10 = smov %s989_s12  ;;  %22 = sbr.rel (!%p20_p2) target bundleno = 6 (0x6), region = 90 }
 0x206   :  { %682 = vsyncpa [#allocation4], 1 }
 0x207   :  { %684 = vsyncpa [#allocation4 + $0x1], 1 }

</bundles_post_ra>
